<compile_context>
chip_gen: v5e
topology: v5e:2x2
jax: 0.10.0
libtpu: 0.0.40
codegen_flags: <defaults>
</compile_context>

<pallas_src>
import functools

import jax
import jax.numpy as jnp
from jax import lax
from jax.experimental import pallas as pl
from jax.experimental.pallas import tpu as pltpu


# ------------------------------------------------------------------ kernels

def _logreg_fullk_kernel(x_ref, w_ref, b_ref, o_ref):
    """Single-K-tile path (whole feature axis resident per batch tile).

    x_ref: (TB, F) VMEM   w_ref: (1, F) VMEM   b_ref: (1, 1) SMEM   o_ref: (TB, 1)
    """
    x = x_ref[...].astype(jnp.float32)
    w = w_ref[...].astype(jnp.float32)            # broadcasts along sublanes
    o_ref[...] = (jnp.sum(x * w, axis=-1, keepdims=True)
                  + b_ref[0, 0]).astype(o_ref.dtype)


def _logreg_ktiled_kernel(x_ref, w_ref, b_ref, o_ref, acc_ref, *, block_k, f_total):
    """K-tiled path.

    x_ref:   (TB, block_k) VMEM   features tile
    w_ref:   (1, F_pad)    VMEM   full (zero-padded) weight, resident across grid
    b_ref:   (1, 1)        SMEM   bias scalar
    o_ref:   (TB, 1)       VMEM   logits tile (same block across k)
    acc_ref: (TB, 128)     VMEM   f32 per-lane partial sums (pure VPU adds per k)
    """
    k = pl.program_id(1)

    @pl.when(k == 0)
    def _():
        acc_ref[...] = jnp.zeros_like(acc_ref)

    x = x_ref[...].astype(jnp.float32)
    start = pl.multiple_of(k * block_k, 128)
    w = w_ref[:, pl.ds(start, block_k)].astype(jnp.float32)   # (1, block_k)

    if f_total % block_k != 0:
        # Ragged K tail: OOB x lanes are undefined (could be NaN/Inf); mask the
        # x side to zero.  The weight is already zero-padded, so the product is
        # exactly zero on padded lanes.
        lane = start + lax.broadcasted_iota(jnp.int32, (1, block_k), 1)
        x = jnp.where(lane < f_total, x, 0.0)

    # Per-lane partial sums: VPU multiply + add only, no XLU work in the hot path.
    acc = acc_ref[...]
    for j in range(block_k // 128):                # static unroll over 128-lane chunks
        sl = slice(j * 128, (j + 1) * 128)
        acc = acc + x[:, sl] * w[:, sl]
    acc_ref[...] = acc

    @pl.when(k == pl.num_programs(1) - 1)
    def _():
        # Single cross-lane reduce per batch tile (instead of per k step).
        o_ref[...] = (jnp.sum(acc, axis=-1, keepdims=True)
                      + b_ref[0, 0]).astype(o_ref.dtype)


# ----------------------------------------------------------------- sizing

def _vmem_capacity_bytes():
    try:
        info = pltpu.get_tpu_info()
        cap = getattr(info, "vmem_capacity_bytes", None)
        if cap:
            return int(cap)
    except Exception:
        pass
    return 64 << 20   # conservative fallback (v7x per-core VMEM)


def _per_buffer_budget_bytes(vmem_capacity):
    # v7x: 64 MiB VMEM per TC -> ~14 MiB per x buffer (2 buffers ~= 28 MiB).
    # v5e/v6e: 128 MiB VMEM   -> ~28 MiB per x buffer (2 buffers ~= 56 MiB).
    if vmem_capacity <= (64 << 20):
        return 14 << 20
    return 28 << 20


def _pick_block_k(F, max_block_k=2048):
    """Whole F in one tile when small; otherwise a fixed 128-multiple K tile
    (the ragged tail is masked in-kernel, so no exact-divisor requirement)."""
    if F <= max_block_k:
        return F
    return max_block_k


def _pick_block_batch(B, block_k, itemsize, per_buffer_bytes):
    rows = per_buffer_bytes // max(block_k * itemsize, 1)
    rows = max((rows // 16) * 16, 16)     # multiple of 16: legal sublane tile for f32 & bf16
    return B if rows >= B else rows


# ------------------------------------------------------------- pallas call

@functools.partial(jax.jit, static_argnames=("block_batch", "block_k", "vmem_capacity"))
def _logreg_pallas(features, weight_padded, bias2d, *, block_batch, block_k, vmem_capacity):
    B, F = features.shape
    F_pad = weight_padded.shape[1]
    num_k = F_pad // block_k
    itemsize = features.dtype.itemsize

    # VMEM requirement: double-buffered x tile + resident weight (counted as two
    # buffers to be safe) + double-buffered output tile + lane-partial accumulator.
    need = (2 * block_batch * block_k * itemsize
            + 2 * F_pad * weight_padded.dtype.itemsize
            + 2 * block_batch * 4
            + block_batch * 128 * 4)
    vmem_limit = max(need + (2 << 20), 16 << 20)
    vmem_limit = min(vmem_limit, vmem_capacity)
    vmem_limit = max(vmem_limit, need)          # never clamp below the real need
    vmem_limit = int(vmem_limit)

    if num_k == 1:
        # Small-F fast path: no K grid axis, no accumulator scratch.
        return pl.pallas_call(
            _logreg_fullk_kernel,
            out_shape=jax.ShapeDtypeStruct((B, 1), features.dtype),
            grid_spec=pltpu.PrefetchScalarGridSpec(
                num_scalar_prefetch=0,
                grid=(pl.cdiv(B, block_batch),),
                in_specs=[
                    pl.BlockSpec((block_batch, F), lambda i: (i, 0)),
                    pl.BlockSpec((1, F), lambda i: (0, 0)),
                    pl.BlockSpec(memory_space=pltpu.MemorySpace.SMEM),
                ],
                out_specs=pl.BlockSpec((block_batch, 1), lambda i: (i, 0)),
            ),
            compiler_params=pltpu.CompilerParams(
                dimension_semantics=("parallel",),
                vmem_limit_bytes=vmem_limit,
            ),
        )(features, weight_padded, bias2d)

    kernel = functools.partial(_logreg_ktiled_kernel, block_k=block_k, f_total=F)
    return pl.pallas_call(
        kernel,
        out_shape=jax.ShapeDtypeStruct((B, 1), features.dtype),
        grid_spec=pltpu.PrefetchScalarGridSpec(
            num_scalar_prefetch=0,
            grid=(pl.cdiv(B, block_batch), num_k),
            in_specs=[
                pl.BlockSpec((block_batch, block_k), lambda i, k: (i, k)),
                # Constant index_map -> weight DMA'd once and kept resident.
                pl.BlockSpec((1, F_pad), lambda i, k: (0, 0)),
                pl.BlockSpec(memory_space=pltpu.MemorySpace.SMEM),
            ],
            out_specs=pl.BlockSpec((block_batch, 1), lambda i, k: (i, 0)),
            scratch_shapes=[pltpu.VMEM((block_batch, 128), jnp.float32)],
        ),
        compiler_params=pltpu.CompilerParams(
            # "parallel" batch axis shards across v7x's 2 TensorCores.
            # TODO(synk): if a trace shows only one TC active on v7x, switch this
            # axis to pltpu.CORE_PARALLEL or an explicit pl.core_map core axis.
            dimension_semantics=("parallel", "arbitrary"),
            vmem_limit_bytes=vmem_limit,
        ),
    )(features, weight_padded, bias2d)


# ----------------------------------------------------------------- wrapper

def logistic_regression_forward(features, weight, bias, *, block_batch=None, block_k=None):
    """Return logits (not probabilities), shape (batch, 1). Matches nn.Linear(in_features, 1)."""
    features = jnp.asarray(features)
    B, F = features.shape
    weight = jnp.asarray(weight).reshape(1, F)
    bias2d = jnp.asarray(bias).reshape(1, 1).astype(jnp.float32)

    if block_k is None:
        block_k = _pick_block_k(F)
    block_k = int(min(block_k, F))
    if block_k != F:
        assert block_k % 128 == 0, f"block_k must be a multiple of 128, got {block_k}"

    num_k = -(-F // block_k)            # ceil
    F_pad = num_k * block_k
    if F_pad != F:
        # Tiny zero pad keeps in-kernel weight slices in bounds; x tail is masked.
        weight = jnp.pad(weight, ((0, 0), (0, F_pad - F)))

    vmem_capacity = _vmem_capacity_bytes()
    if block_batch is None:
        block_batch = _pick_block_batch(B, block_k, features.dtype.itemsize,
                                        _per_buffer_budget_bytes(vmem_capacity))
    block_batch = int(min(block_batch, B))
    if block_batch != B:
        assert block_batch % 16 == 0, f"block_batch must be a multiple of 16, got {block_batch}"

    # TODO(synk): if the application permits bf16 features in HBM, pass them
    # through directly (kernel accumulates in f32) for ~2x on this HBM-bound op.
    return _logreg_pallas(features, weight, bias2d,
                          block_batch=block_batch, block_k=block_k,
                          vmem_capacity=int(vmem_capacity))


def init_params(key, in_features):
    """Deterministic parameter init (mimics nn.Linear default uniform init)."""
    kw, kb = jax.random.split(key)
    bound = 1.0 / jnp.sqrt(jnp.float32(in_features))
    weight = jax.random.uniform(
        kw, (1, in_features), jnp.float32, minval=-bound, maxval=bound
    )
    bias = jax.random.uniform(kb, (1,), jnp.float32, minval=-bound, maxval=bound)
    return weight, bias


if __name__ == "__main__":
    key = jax.random.PRNGKey(0)
    k_x, k_p, k_x2, k_p2 = jax.random.split(key, 4)

    # Case 1: small shapes consistent with the module (batch=8, in_features=32).
    batch, in_features = 8, 32
    x = jax.random.normal(k_x, (batch, in_features), jnp.float32)
    weight, bias = init_params(k_p, in_features)

    out = jax.block_until_ready(logistic_regression_forward(x, weight, bias))
    ref = x @ weight.T + bias
    assert out.shape == (batch, 1)
    assert jnp.allclose(out, ref, atol=1e-5, rtol=1e-5)

    # Case 2: exercise ragged batch tiling, K tiling, K-tail masking and the
    # zero-padded resident weight (F=300 is not a multiple of 128).
    batch2, feat2 = 136, 300
    x2 = jax.random.normal(k_x2, (batch2, feat2), jnp.float32)
    w2, b2 = init_params(k_p2, feat2)
    out2 = jax.block_until_ready(
        logistic_regression_forward(x2, w2, b2, block_batch=64, block_k=128)
    )
    ref2 = x2 @ w2.T + b2
    assert out2.shape == (batch2, 1)
    assert jnp.allclose(out2, ref2, atol=1e-4, rtol=1e-4)

    print("KERNEL_OK")
</pallas_src>

<mosaic_0001>
module attributes {stable_mosaic.version = 11 : i64} {
  func.func @_logreg_fullk_kernel(%arg0: i32, %arg1: memref<8x32xf32, #tpu.memory_space<vmem>>, %arg2: memref<1x32xf32, #tpu.memory_space<vmem>>, %arg3: memref<1x1xf32, #tpu.memory_space<smem>>, %arg4: memref<8x1xf32, #tpu.memory_space<vmem>>) attributes {dimension_semantics = [#tpu.dimension_semantics<parallel>], iteration_bounds = array<i64: 1>, scalar_prefetch = 0 : i64, scratch_operands = 0 : i64, tpu.core_type = #tpu.core_type<tc>, window_params = [{transform_indices = @transform_0, window_bounds = array<i64: 8, 32>}, {pipeline_mode = #tpu.pipeline_mode<synchronous>, transform_indices = @transform_1, window_bounds = array<i64: 1, 32>}, {transform_indices = @transform_2, window_bounds = array<i64: 1, 1>}, {transform_indices = @transform_3, window_bounds = array<i64: 8, 1>}]} {
    %c0 = arith.constant 0 : index
    %c0_0 = arith.constant 0 : index
    %0 = vector.load %arg1[%c0, %c0_0] : memref<8x32xf32, #tpu.memory_space<vmem>>, vector<8x32xf32>
    %c0_1 = arith.constant 0 : index
    %c0_2 = arith.constant 0 : index
    %1 = vector.load %arg2[%c0_1, %c0_2] : memref<1x32xf32, #tpu.memory_space<vmem>>, vector<1x32xf32>
    %2 = vector.broadcast %1 : vector<1x32xf32> to vector<8x32xf32>
    %3 = arith.mulf %0, %2 : vector<8x32xf32>
    %cst = arith.constant dense<0.000000e+00> : vector<8xf32>
    %4 = vector.multi_reduction <add>, %3, %cst [1] : vector<8x32xf32> to vector<8xf32>
    %5 = vector.shape_cast %4 : vector<8xf32> to vector<8x1xf32>
    %c0_3 = arith.constant 0 : index
    %c0_4 = arith.constant 0 : index
    %6 = memref.load %arg3[%c0_3, %c0_4] : memref<1x1xf32, #tpu.memory_space<smem>>
    %7 = vector.broadcast %6 : f32 to vector<8x1xf32>
    %8 = arith.addf %5, %7 : vector<8x1xf32>
    %c0_5 = arith.constant 0 : index
    %c0_6 = arith.constant 0 : index
    %9 = vector.load %arg4[%c0_5, %c0_6] : memref<8x1xf32, #tpu.memory_space<vmem>>, vector<8x1xf32>
    tpu.vector_store %arg4[%c0_5, %c0_6], %8 {strides = array<i32>} : memref<8x1xf32, #tpu.memory_space<vmem>>, vector<8x1xf32>,
    return
  }
  func.func @transform_0(%arg0: i32) -> (i32, i32) {
    %c0_i32 = arith.constant 0 : i32
    %c0_i32_0 = arith.constant 0 : i32
    return %arg0, %c0_i32 : i32, i32
  }
  func.func @transform_1(%arg0: i32) -> (i32, i32) {
    %c0_i32 = arith.constant 0 : i32
    %c0_i32_0 = arith.constant 0 : i32
    %c0_i32_1 = arith.constant 0 : i32
    return %c0_i32, %c0_i32_0 : i32, i32
  }
  func.func @transform_2(%arg0: i32) -> (i32, i32) {
    %c0_i32 = arith.constant 0 : i32
    %c0_i32_0 = arith.constant 0 : i32
    %c0_i32_1 = arith.constant 0 : i32
    return %c0_i32, %c0_i32_0 : i32, i32
  }
  func.func @transform_3(%arg0: i32) -> (i32, i32) {
    %c0_i32 = arith.constant 0 : i32
    %c0_i32_0 = arith.constant 0 : i32
    return %arg0, %c0_i32 : i32, i32
  }
}

</mosaic_0001>

<bundles_post_ra>
// kernel: _logreg_pallas.1
= control target key start
LH: loop header
LB: loop body
LE: loop exit
PB: predicated region body
PF: predicated region fallthrough
CT: control target
= control target key end

     0   :  { %9 = vsyncpa [#allocation4], 0  ;;  %s77_s15 = smov [#allocation3]   ;;  %s110_s0 = inlined_call_operand.hbm [shape: f32[8,32], index: 0, kind: input, shape index: {}]   ;;  %s111_s1 = inlined_call_operand.vmem [shape: f32[1,32], index: 1, kind: input, shape index: {}]   ;;  %s112_s2 = inlined_call_operand.<no memory space> [shape: f32[1,1], index: 2, kind: input, shape index: {}]   ;;  %s113_s3 = inlined_call_operand.vmem [shape: f32[8,1], index: 3, kind: output, shape index: {}]  }
   0x1   :  { %s15_s14 = sshll.u32 %s110_s0, 4  ;;  %s17_s16 = sshll.u32 %s77_s15, 4  ;;  %s16_s14 = int_to_ptr.hbm [resolvable:$true] %s15_s14  ;;  %s18_s16 = int_to_ptr.vmem [resolvable:$true] %s17_s16 }
   0x2   :  { %20 = dma.hbm_to_vmem [thread:$0]  %s16_s14, 128, %s18_s16, [#allocation4]  }
   0x3   :  { %75 = dma.done.wait [#allocation4], 128  }
   0x4   :  { %76 = vsyncadd [#allocation4], 4294967168  ;;  %v29_v0 = vld [vmem:[#allocation3] sm:$0xff]  ;;  %vm35_vm0 = vcmask 261120   ;;  %v40_v4 = vstv %s112_s2  ;;  %vm42_vm1 = vcmask 7168  }
   0x5   :  { %v50_v1 = vld [vmem:[%s111_s1] ss:$0 sm:$0xff] }
   0x6   :  { %v34_v2 = vmul.f32 %v50_v1, %v29_v0 }
   0x8   :  { %v36_v3 = vsel %vm35_vm0, %v34_v2, 0.0 }
   0x9   :  { %37 = vadd.xlane.f32.xlu0 %v36_v3 }
  0x7c   :  { %v38_v5 = vpop.xlane.xlu0 %37 }
  0x7d   :  { %v41_v6 = vadd.f32 %v40_v4, %v38_v5 }
  0x7f   :  { %43 = vst.msk [vmem:[%s113_s3] sm:$0xff] %vm42_vm1, %v41_v6 }
  0x80   :  { %48 = vsyncpa [#allocation4], 1 }

</bundles_post_ra>
